<compile_context>
chip_gen: v7x
topology: tpu7x:2x2x1
jax: 0.10.0
libtpu: 0.0.40
codegen_flags: <defaults>
</compile_context>

<pallas_src>
import jax
import jax.numpy as jnp
from jax.experimental import pallas as pl
from jax.experimental.pallas import tpu as pltpu

LANE = 128  # lane width: batch tile is a multiple of this


def _round_up(x, m):
    return (x + m - 1) // m * m


def mlp_kernel(x_ref, w1_ref, b1_ref, w2_ref, b2_ref, o_ref):
    """One batch tile, batch on the lane axis.

    VMEM block shapes:
      x_ref : (F, TN)   input tile (batch on lanes)
      w1_ref: (H, F)    hidden weight (PyTorch layout)
      b1_ref: (H, 1)
      w2_ref: (H, O)    predict weight, pre-transposed
      b2_ref: (O, 1)
      o_ref : (O, TN)   output tile (batch on lanes, lane-dense store)
    """
    xT = x_ref[...]
    w1 = w1_ref[...]
    w2 = w2_ref[...]
    f_dim = xT.shape[0]
    o_dim = w2.shape[1]

    # Layer 1 (VPU): hT[h, n] = b1[h] + sum_f w1[h, f] * x[f, n].
    # F is tiny (2), so an outer-product accumulation beats a K=2 MXU pass.
    acc = b1_ref[...].astype(jnp.float32)                       # (H, 1)
    for fi in range(f_dim):                                     # static, F=2
        acc = acc + (w1[:, fi:fi + 1].astype(jnp.float32)
                     * xT[fi:fi + 1, :].astype(jnp.float32))    # (H, TN)
    hT = jnp.maximum(acc, 0.0)

    # Layer 2 (VPU mul + XLU sublane reduce):
    #   out[o, n] = b2[o] + sum_h w2[h, o] * hT[h, n]
    for oi in range(o_dim):                                     # static, O=2
        r = jnp.sum(w2[:, oi:oi + 1].astype(jnp.float32) * hT,
                    axis=0, keepdims=True)                      # (1, TN)
        r = r + b2_ref[oi:oi + 1, :].astype(jnp.float32)
        o_ref[oi:oi + 1, :] = r.astype(o_ref.dtype)


def prepare_params(hidden_w, hidden_b, predict_w, predict_b):
    """One-time layout prep (call once, reuse every forward step).

    PyTorch nn.Linear layout in -> kernel layout out:
      hidden_w  (H, F), hidden_b  (H,)  ->  w1 (H, F), b1 (H, 1)
      predict_w (O, H), predict_b (O,)  ->  w2 (H, O), b2 (O, 1)
    """
    return (hidden_w,
            hidden_b.reshape(-1, 1),
            predict_w.T,
            predict_b.reshape(-1, 1))


def net_forward(x, params, *, block_n=1024):
    """relu(x @ hidden_w.T + hidden_b) @ predict_w.T + predict_b via one Pallas call."""
    w1, b1, w2, b2 = params
    n, f = x.shape
    h_dim, o_dim = w1.shape[0], w2.shape[1]

    # Batch tile: a multiple of 128 lanes (robust to arbitrary block_n), no
    # larger than the rounded-up batch so small batches stay a single step.
    tn = min(_round_up(max(block_n, LANE), LANE), _round_up(n, LANE))
    np_ = _round_up(n, tn)

    # Transposed layout: batch rides the lane axis; only the batch tail is
    # zero-padded (exact: padded columns are sliced off below).  x/out HBM
    # bytes stay at N*F / N*O floats — no 128-lane padding round-trip.
    xT = jnp.zeros((f, np_), x.dtype).at[:, :n].set(x.T)

    out_dtype = jnp.result_type(x.dtype, w1.dtype)
    itemsize = jnp.dtype(out_dtype).itemsize
    cost = pl.CostEstimate(
        flops=2 * n * (f * h_dim + h_dim * o_dim),
        transcendentals=0,
        bytes_accessed=int(xT.size + w1.size + b1.size + w2.size + b2.size
                           + np_ * o_dim) * itemsize,
    )

    # Per-step VMEM footprint: 2 bufs * (F + O) * tn * 4B + weights ≈ a few
    # hundred KiB even at tn=2048 — far below v7x's 32 MiB scoped default, so
    # no explicit vmem_limit_bytes is needed at this size.
    outT = pl.pallas_call(
        mlp_kernel,
        out_shape=jax.ShapeDtypeStruct((o_dim, np_), out_dtype),
        grid=(np_ // tn,),
        in_specs=[
            # x tiled over the batch (lane) axis, double-buffered by the pipeline.
            pl.BlockSpec((f, tn), lambda i: (0, i)),
            # Weights / biases: same block every step -> fetched once, VMEM-resident.
            pl.BlockSpec((h_dim, f), lambda i: (0, 0)),
            pl.BlockSpec((h_dim, 1), lambda i: (0, 0)),
            pl.BlockSpec((h_dim, o_dim), lambda i: (0, 0)),
            pl.BlockSpec((o_dim, 1), lambda i: (0, 0)),
        ],
        out_specs=pl.BlockSpec((o_dim, tn), lambda i: (0, i)),
        compiler_params=pltpu.CompilerParams(
            dimension_semantics=("parallel",),   # batch axis shardable across TCs
        ),
        cost_estimate=cost,
    )(xT, w1, b1, w2, b2)

    return outT[:, :n].T


if __name__ == "__main__":
    key = jax.random.PRNGKey(0)
    k_x0, k_x1, k_h, k_p = jax.random.split(key, 4)

    # Net(n_feature=2, n_hidden=32, n_output=2); 200 samples (two Gaussian
    # clusters) as in the original classification script.
    n_batch, n_feature, n_hidden, n_output = 200, 2, 32, 2

    x0 = 2.0 + jax.random.normal(k_x0, (n_batch // 2, n_feature), jnp.float32)
    x1 = -2.0 + jax.random.normal(k_x1, (n_batch // 2, n_feature), jnp.float32)
    x = jnp.concatenate([x0, x1], axis=0)

    # torch.nn.Linear default init: U(-1/sqrt(fan_in), 1/sqrt(fan_in)),
    # weights stored in PyTorch layout (out_features, in_features).
    def linear_init(k, fan_in, fan_out):
        kw, kb = jax.random.split(k)
        bound = 1.0 / jnp.sqrt(jnp.float32(fan_in))
        w = jax.random.uniform(kw, (fan_out, fan_in), jnp.float32, -bound, bound)
        b = jax.random.uniform(kb, (fan_out,), jnp.float32, -bound, bound)
        return w, b

    hidden_w, hidden_b = linear_init(k_h, n_feature, n_hidden)
    predict_w, predict_b = linear_init(k_p, n_hidden, n_output)

    # One-time layout prep, hoisted out of the per-call path.
    params = prepare_params(hidden_w, hidden_b, predict_w, predict_b)

    # block_n=128 so this small demo still exercises 2 grid steps + tail padding.
    out = net_forward(x, params, block_n=128)
    out = jax.block_until_ready(out)

    # Correctness check against a plain-JAX reference of the same forward pass.
    ref = jnp.maximum(x @ hidden_w.T + hidden_b, 0.0) @ predict_w.T + predict_b
    assert out.shape == (n_batch, n_output)
    assert jnp.allclose(out, ref, atol=1e-4, rtol=1e-4), float(
        jnp.max(jnp.abs(out - ref)))

    print("KERNEL_OK")
</pallas_src>

<mosaic_0001>
module attributes {stable_mosaic.version = 11 : i64} {
  func.func @mlp_kernel(%arg0: i32, %arg1: memref<2x128xf32, #tpu.memory_space<vmem>>, %arg2: memref<32x2xf32, #tpu.memory_space<vmem>>, %arg3: memref<32x1xf32, #tpu.memory_space<vmem>>, %arg4: memref<32x2xf32, #tpu.memory_space<vmem>>, %arg5: memref<2x1xf32, #tpu.memory_space<vmem>>, %arg6: memref<2x128xf32, #tpu.memory_space<vmem>>) attributes {dimension_semantics = [#tpu.dimension_semantics<parallel>], iteration_bounds = array<i64: 2>, scalar_prefetch = 0 : i64, scratch_operands = 0 : i64, tpu.core_type = #tpu.core_type<tc>, window_params = [{transform_indices = @transform_0, window_bounds = array<i64: 2, 128>}, {pipeline_mode = #tpu.pipeline_mode<synchronous>, transform_indices = @transform_1, window_bounds = array<i64: 32, 2>}, {pipeline_mode = #tpu.pipeline_mode<synchronous>, transform_indices = @transform_2, window_bounds = array<i64: 32, 1>}, {pipeline_mode = #tpu.pipeline_mode<synchronous>, transform_indices = @transform_3, window_bounds = array<i64: 32, 2>}, {pipeline_mode = #tpu.pipeline_mode<synchronous>, transform_indices = @transform_4, window_bounds = array<i64: 2, 1>}, {transform_indices = @transform_5, window_bounds = array<i64: 2, 128>}]} {
    %c0 = arith.constant 0 : index
    %c0_0 = arith.constant 0 : index
    %0 = vector.load %arg1[%c0, %c0_0] : memref<2x128xf32, #tpu.memory_space<vmem>>, vector<2x128xf32>
    %c0_1 = arith.constant 0 : index
    %c0_2 = arith.constant 0 : index
    %1 = vector.load %arg2[%c0_1, %c0_2] : memref<32x2xf32, #tpu.memory_space<vmem>>, vector<32x2xf32>
    %c0_3 = arith.constant 0 : index
    %c0_4 = arith.constant 0 : index
    %2 = vector.load %arg4[%c0_3, %c0_4] : memref<32x2xf32, #tpu.memory_space<vmem>>, vector<32x2xf32>
    %c0_5 = arith.constant 0 : index
    %c0_6 = arith.constant 0 : index
    %3 = vector.load %arg3[%c0_5, %c0_6] : memref<32x1xf32, #tpu.memory_space<vmem>>, vector<32x1xf32>
    %4 = vector.extract_strided_slice %1 {offsets = [0, 0], sizes = [32, 1], strides = [1, 1]} : vector<32x2xf32> to vector<32x1xf32>
    %5 = vector.extract_strided_slice %0 {offsets = [0, 0], sizes = [1, 128], strides = [1, 1]} : vector<2x128xf32> to vector<1x128xf32>
    %6 = vector.broadcast %4 : vector<32x1xf32> to vector<32x128xf32>
    %7 = vector.broadcast %5 : vector<1x128xf32> to vector<32x128xf32>
    %8 = arith.mulf %6, %7 : vector<32x128xf32>
    %9 = vector.broadcast %3 : vector<32x1xf32> to vector<32x128xf32>
    %10 = arith.addf %9, %8 : vector<32x128xf32>
    %11 = vector.extract_strided_slice %1 {offsets = [0, 1], sizes = [32, 1], strides = [1, 1]} : vector<32x2xf32> to vector<32x1xf32>
    %12 = vector.extract_strided_slice %0 {offsets = [1, 0], sizes = [1, 128], strides = [1, 1]} : vector<2x128xf32> to vector<1x128xf32>
    %13 = vector.broadcast %11 : vector<32x1xf32> to vector<32x128xf32>
    %14 = vector.broadcast %12 : vector<1x128xf32> to vector<32x128xf32>
    %15 = arith.mulf %13, %14 : vector<32x128xf32>
    %16 = arith.addf %10, %15 : vector<32x128xf32>
    %cst = arith.constant 0.000000e+00 : f32
    %17 = vector.broadcast %cst : f32 to vector<32x128xf32>
    %18 = arith.maximumf %16, %17 : vector<32x128xf32>
    %19 = vector.extract_strided_slice %2 {offsets = [0, 0], sizes = [32, 1], strides = [1, 1]} : vector<32x2xf32> to vector<32x1xf32>
    %20 = vector.broadcast %19 : vector<32x1xf32> to vector<32x128xf32>
    %21 = arith.mulf %20, %18 : vector<32x128xf32>
    %cst_7 = arith.constant dense<0.000000e+00> : vector<128xf32>
    %22 = vector.multi_reduction <add>, %21, %cst_7 [0] : vector<32x128xf32> to vector<128xf32>
    %23 = vector.shape_cast %22 : vector<128xf32> to vector<1x128xf32>
    %c0_8 = arith.constant 0 : index
    %c0_9 = arith.constant 0 : index
    %24 = vector.load %arg5[%c0_8, %c0_9] : memref<2x1xf32, #tpu.memory_space<vmem>>, vector<1x1xf32>
    %25 = vector.broadcast %24 : vector<1x1xf32> to vector<1x128xf32>
    %26 = arith.addf %23, %25 : vector<1x128xf32>
    %c0_10 = arith.constant 0 : index
    %c0_11 = arith.constant 0 : index
    %27 = vector.load %arg6[%c0_10, %c0_11] : memref<2x128xf32, #tpu.memory_space<vmem>>, vector<1x128xf32>
    tpu.vector_store %arg6[%c0_10, %c0_11], %26 {strides = array<i32>} : memref<2x128xf32, #tpu.memory_space<vmem>>, vector<1x128xf32>,
    %28 = vector.extract_strided_slice %2 {offsets = [0, 1], sizes = [32, 1], strides = [1, 1]} : vector<32x2xf32> to vector<32x1xf32>
    %29 = vector.broadcast %28 : vector<32x1xf32> to vector<32x128xf32>
    %30 = arith.mulf %29, %18 : vector<32x128xf32>
    %cst_12 = arith.constant dense<0.000000e+00> : vector<128xf32>
    %31 = vector.multi_reduction <add>, %30, %cst_12 [0] : vector<32x128xf32> to vector<128xf32>
    %32 = vector.shape_cast %31 : vector<128xf32> to vector<1x128xf32>
    %c1 = arith.constant 1 : index
    %c0_13 = arith.constant 0 : index
    %33 = vector.load %arg5[%c1, %c0_13] : memref<2x1xf32, #tpu.memory_space<vmem>>, vector<1x1xf32>
    %34 = vector.broadcast %33 : vector<1x1xf32> to vector<1x128xf32>
    %35 = arith.addf %32, %34 : vector<1x128xf32>
    %c1_14 = arith.constant 1 : index
    %c0_15 = arith.constant 0 : index
    %36 = vector.load %arg6[%c1_14, %c0_15] : memref<2x128xf32, #tpu.memory_space<vmem>>, vector<1x128xf32>
    tpu.vector_store %arg6[%c1_14, %c0_15], %35 {strides = array<i32>} : memref<2x128xf32, #tpu.memory_space<vmem>>, vector<1x128xf32>,
    return
  }
  func.func @transform_0(%arg0: i32) -> (i32, i32) {
    %c0_i32 = arith.constant 0 : i32
    %c0_i32_0 = arith.constant 0 : i32
    return %c0_i32, %arg0 : i32, i32
  }
  func.func @transform_1(%arg0: i32) -> (i32, i32) {
    %c0_i32 = arith.constant 0 : i32
    %c0_i32_0 = arith.constant 0 : i32
    %c0_i32_1 = arith.constant 0 : i32
    return %c0_i32, %c0_i32_0 : i32, i32
  }
  func.func @transform_2(%arg0: i32) -> (i32, i32) {
    %c0_i32 = arith.constant 0 : i32
    %c0_i32_0 = arith.constant 0 : i32
    %c0_i32_1 = arith.constant 0 : i32
    return %c0_i32, %c0_i32_0 : i32, i32
  }
  func.func @transform_3(%arg0: i32) -> (i32, i32) {
    %c0_i32 = arith.constant 0 : i32
    %c0_i32_0 = arith.constant 0 : i32
    %c0_i32_1 = arith.constant 0 : i32
    return %c0_i32, %c0_i32_0 : i32, i32
  }
  func.func @transform_4(%arg0: i32) -> (i32, i32) {
    %c0_i32 = arith.constant 0 : i32
    %c0_i32_0 = arith.constant 0 : i32
    %c0_i32_1 = arith.constant 0 : i32
    return %c0_i32, %c0_i32_0 : i32, i32
  }
  func.func @transform_5(%arg0: i32) -> (i32, i32) {
    %c0_i32 = arith.constant 0 : i32
    %c0_i32_0 = arith.constant 0 : i32
    return %c0_i32, %arg0 : i32, i32
  }
}

</mosaic_0001>

<bundles_post_ra>
// kernel: tpu_custom_call.1
= control target key start
LH: loop header
LB: loop body
LE: loop exit
PB: predicated region body
PF: predicated region fallthrough
CT: control target
= control target key end

     0   :  { %10 = vsyncpa [#allocation3], 0  ;;  %s765_s0 = inlined_call_operand.vmem [shape: f32[2,256], index: 0, kind: input, shape index: {}]   ;;  %s766_s1 = inlined_call_operand.vmem [shape: f32[32,2], index: 1, kind: input, shape index: {}]   ;;  %s767_s2 = inlined_call_operand.vmem [shape: f32[32,1], index: 2, kind: input, shape index: {}]   ;;  %s768_s3 = inlined_call_operand.vmem [shape: f32[32,2], index: 3, kind: input, shape index: {}]   ;;  %s769_s4 = inlined_call_operand.vmem [shape: f32[2,1], index: 4, kind: input, shape index: {}]   ;;  %s770_s5 = inlined_call_operand.hbm [shape: f32[2,256], index: 5, kind: output, shape index: {}]  }
   0x1   :  { %12 = vsyncpa [#allocation3 + $0x1], 0  ;;  %s623_s18 = smov 0   ;;  %s625_s19 = smov 0  }
   0x2   :  { %s627_s20 = smov 0   ;;  %s629_s21 = smov 0  }
   0x3 LB: > { %s644_s22 = sadd.s32 4294967295, %s588_s21   ;;  %s468_s23 = sadd.s32 4294967294, %s588_s21   ;;  %s588_s21 = sphi %s629_s21, %s776_s21   ;;  %s584_s20 = sphi %s627_s20, %s775_s20   ;;  %s580_s19 = sphi %s625_s19, %s774_s19   ;;  %s576_s18 = sphi %s623_s18, %s773_s18  }
   0x4   : > { %s648_s24 = sadd.s32 1, %s588_s21   ;;  %s135_s25 = sadd.s32 1, %s584_s20 }
   0x5   : > { %s132_s26 = ssub.s32 %s588_s21, %s648_s24  ;;  %p145_p0 = scmp.ne.s32.totalorder %s584_s20, %s580_s19 }
   0x6   : > { %p133_p1 = scmp.eq.s32.totalorder %s132_s26, 0  ;;  %p146_p2 = scmp.eq.s32.totalorder %s644_s22, 1 }
   0x7   : > { %p151_p3 = scmp.ne.s32.totalorder %s580_s19, %s576_s18  ;;  %p152_p4 = scmp.eq.s32.totalorder %s468_s23, 1 }
   0x8   : > { %s659_s27 = scalar_select %p133_p1, %s584_s20, %s135_s25  }
   0x9   : > { %p661_p5 = por %p146_p2, %p145_p0  ;;  %p665_p6 = por %p152_p4, %p151_p3 }
   0xa   : > { %p471_p7 = scmp.ge.s32.totalorder %s588_s21, 1  ;;  %p189_p8 = scmp.lt.s32.totalorder %s588_s21, 3 }
   0xc   : > { %p190_p9 = pnand %p471_p7, %p189_p8 }
   0xd   : > { %v223_v0 = vld [vmem:[%s766_s1 + $0x10] sm:$0xff] (!%p190_p9)  ;;  %v222_v1 = vld [vmem:[%s766_s1 + $0x8] sm:$0xff] (!%p190_p9)  ;;  %v590_v2 = vmov (!%p190_p9), 1   ;;  %v591_v3 = vmov (!%p190_p9), 0   ;;  %v229_v4 = vld [vmem:[%s767_s2] sm:$0xff] (!%p190_p9)  ;;  %p216_p10 = scmp.lt.s32.totalorder (!%p190_p9), %s644_s22, 1  ;;  %v253_v16 = vlaneseq (!%p190_p9) }
   0xe   : > { %193 = sbr.rel (%p190_p9) target bundleno = 218 (0xda), region = 40  ;;  %521 = vset.pattern.permute.xlu0 (!%p190_p9), %v590_v2  ;;  %519 = vset.pattern.permute.xlu1 (!%p190_p9), %v591_v3  ;;  %v224_v5 = vld [vmem:[%s766_s1 + $0x18] sm:$0xff] (!%p190_p9)  ;;  %v221_v6 = vld [vmem:[%s766_s1] sm:$0xff] (!%p190_p9)  ;;  %v231_v7 = vld [vmem:[%s767_s2 + $0x10] sm:$0xff] (!%p190_p9)  ;;  %s213_s6 = sand.u32 (!%p190_p9), 1, %s580_s19  }
   0xf   : > { %245 = vperm.xlu1 (!%p190_p9), %519, %v223_v0   ;;  %290 = vperm.xlu0 (!%p190_p9), %521, %v222_v1   ;;  %v230_v8 = vld [vmem:[%s767_s2 + $0x8] sm:$0xff] (!%p190_p9)  ;;  %v232_v9 = vld [vmem:[%s767_s2 + $0x18] sm:$0xff] (!%p190_p9)  ;;  %v225_v11 = vld [vmem:[%s768_s3] sm:$0xff] (!%p190_p9)  ;;  %v254_v19 = vshrl.u32 (!%p190_p9), %v253_v16, 7  ;;  %s472_s7 = sshll.u32 (!%p190_p9), %s213_s6, 1  ;;  %s475_s9 = sshll.u32 (!%p190_p9), %s644_s22, 5 }
  0x10   : > { %v226_v10 = vld [vmem:[%s768_s3 + $0x8] sm:$0xff] (!%p190_p9)  ;;  %v227_v12 = vld [vmem:[%s768_s3 + $0x10] sm:$0xff] (!%p190_p9)  ;;  %v228_v13 = vld [vmem:[%s768_s3 + $0x18] sm:$0xff] (!%p190_p9)  ;;  %s215_s8 = scalar_lea.vmem (!%p190_p9), [#allocation2], %s472_s7  ;;  %s723_s13 = scalar_lea.hbm (!%p190_p9), %s770_s5, %s475_s9 }
  0x11   : > { %v350_v14 = vld [vmem:[%s769_s4] sm:$0x1] (!%p190_p9)  ;;  %v387_v15 = vld [vmem:[%s769_s4 + $0x1] sm:$0x1] (!%p190_p9)  ;;  %v255_v22 = vsub.s32 (!%p190_p9), 0, %v254_v19  ;;  %v303_v26 = vsub.s32 (!%p190_p9), 1, %v254_v19 }
  0x12   : > { %s409_s10 = sshll.u32 (!%p190_p9), %s215_s8, 4  ;;  %s396_s14 = scalar_lea.sflag (!%p190_p9), [#allocation3], %s213_s6  ;;  %s725_s10 = int_to_ptr.vmem [resolvable:$true] %s409_s10 }
  0x13   : > { %263 = vperm.xlu1 (!%p190_p9), %519, %v229_v4   ;;  %294 = vperm.xlu0 (!%p190_p9), %521, %v223_v0   ;;  %s526_s15 = scalar_lea.vmem (!%p190_p9), %s725_s10, 32 }
  0x14   : > { %p527_p11 = scmp.ne.s32.totalorder (!%p190_p9), %s725_s10, %s526_s15 }
  0x15   : > { %s217_s17 = scalar_select %p216_p10, %s644_s22, 1 }
  0x16   : > { %p528_p12 = pnand %p527_p11, %p661_p5  ;;  %s592_s22 = smov [#allocation2]  }
  0x17   : > { %520 = vset.pattern.permute.xlu1 %v590_v2  ;;  %298 = vperm.xlu0 %521, %v224_v5   ;;  %s473_s23 = sshll.u32 %s217_s17, 1  ;;  %s530_s16 = sshll.u32 %s592_s22, 4  ;;  %s531_s16 = int_to_ptr.vmem [resolvable:$false] %s530_s16 }
  0x18   : > { %286 = vperm.xlu1 %520, %v221_v6   ;;  %s219_s30 = scalar_lea.vmem %s765_s0, %s473_s23  ;;  %p529_p13 = pneg %p528_p12 }
  0x19   : > { %v220_v24 = vld [vmem:[%s219_s30] sm:$0x3]  ;;  %s532_s17 = scalar_lea.vmem %s531_s16, 64  ;;  %p533_p0 = scmp.lt.s32.totalorder %s725_s10, %s531_s16 }
  0x1a   : > { %v256_v27 = vrot.slane %v220_v24, %v255_v22  ;;  %v304_v31 = vrot.slane %v220_v24, %v303_v26  ;;  %p534_p1 = scmp.lt.s32.totalorder %s532_s17, %s526_s15 }
  0x1b   : > { %523 = vset.pattern.permute.xlu0 %v591_v3 }
  0x1c   : > { %235 = vperm.xlu0 %523, %v221_v6   ;;  %522 = vset.pattern.permute.xlu1 %v591_v3  ;;  %p535_p2 = por %p534_p1, %p533_p0 }
  0x1d   : > { %250 = vperm.xlu1 %522, %v224_v5  }
  0x1e   : > { %p536_p3 = pnand %p535_p2, %p529_p13 }
  0x20   : > { %240 = vperm.xlu0 %523, %v222_v1  }
  0x21   : > { %273 = vperm.xlu1 %522, %v231_v7  }
  0x24   : > { %268 = vperm.xlu0 %523, %v230_v8  }
  0x25   : > { %278 = vperm.xlu1 %522, %v232_v9  }
  0x28   : > { %324 = vperm.xlu0 %523, %v226_v10  }
  0x29   : > { %319 = vperm.xlu1 %522, %v225_v11  }
  0x2c   : > { %329 = vperm.xlu0 %523, %v227_v12  }
  0x2d   : > { %524 = vset.pattern.permute.xlu1 %v590_v2 }
  0x2e   : > { %359 = vperm.xlu1 %524, %v225_v11  }
  0x30   : > { %334 = vperm.xlu0 %523, %v228_v13  }
  0x32   : > { %363 = vperm.xlu1 %524, %v226_v10  }
  0x34   : > { %353 = vperm.xlu0 %523, %v350_v14  }
  0x36   : > { %367 = vperm.xlu1 %524, %v227_v12  }
  0x3a   : > { %371 = vperm.xlu1 %524, %v228_v13  }
  0x3e   : > { %525 = vset.pattern.permute.xlu1 %v591_v3 }
  0x3f   : > { %390 = vperm.xlu1 %525, %v387_v15  }
  0x8e   : > { %v246_v17 = vpop.permute.xlu1 %245  ;;  %v291_v18 = vpop.permute.xlu0 %290 }
  0x8f   : > { %v259_v34 = vmul.f32 %v256_v27, %v246_v17  ;;  %v306_v41 = vmul.f32 %v304_v31, %v291_v18 }
  0x92   : > { %v264_v20 = vpop.permute.xlu1 %263  ;;  %v295_v21 = vpop.permute.xlu0 %294 }
  0x93   : > { %v307_v42 = vmul.f32 %v304_v31, %v295_v21 }
  0x96   : > { %v299_v23 = vpop.permute.xlu0 %298 }
  0x97   : > { %v287_v25 = vpop.permute.xlu1 %286  ;;  %v308_v51 = vmul.f32 %v304_v31, %v299_v23 }
  0x98   : > { %v305_v37 = vmul.f32 %v304_v31, %v287_v25 }
  0x9b   : > { %v236_v28 = vpop.permute.xlu0 %235 }
  0x9c   : > { %v257_v29 = vmul.f32 %v256_v27, %v236_v28  ;;  %v251_v30 = vpop.permute.xlu1 %250 }
  0x9d   : > { %v260_v43 = vmul.f32 %v256_v27, %v251_v30 }
  0x9e   : > { %v281_v32 = vadd.f32 %v264_v20, %v257_v29 }
  0x9f   : > { %v241_v33 = vpop.permute.xlu0 %240 }
  0xa0   : > { %v258_v35 = vmul.f32 %v256_v27, %v241_v33  ;;  %v274_v36 = vpop.permute.xlu1 %273  ;;  %v309_v40 = vadd.f32 %v305_v37, %v281_v32 }
  0xa1   : > { %v283_v38 = vadd.f32 %v274_v36, %v259_v34 }
  0xa2   : > { %v313_v50 = vmax.f32 %v309_v40, 0.0 }
  0xa3   : > { %v269_v39 = vpop.permute.xlu0 %268  ;;  %v311_v46 = vadd.f32 %v307_v42, %v283_v38 }
  0xa4   : > { %v282_v44 = vadd.f32 %v269_v39, %v258_v35  ;;  %v279_v45 = vpop.permute.xlu1 %278 }
  0xa5   : > { %v284_v48 = vadd.f32 %v279_v45, %v260_v43  ;;  %v315_v57 = vmax.f32 %v311_v46, 0.0 }
  0xa6   : > { %v310_v47 = vadd.f32 %v306_v41, %v282_v44 }
  0xa7   : > { %v325_v49 = vpop.permute.xlu0 %324  ;;  %v312_v55 = vadd.f32 %v308_v51, %v284_v48 }
  0xa8   : > { %v314_v52 = vmax.f32 %v310_v47, 0.0  ;;  %v320_v53 = vpop.permute.xlu1 %319 }
  0xa9   : > { %v337_v54 = vmul.f32 %v320_v53, %v313_v50  ;;  %v316_v62 = vmax.f32 %v312_v55, 0.0 }
  0xaa   : > { %v338_v56 = vmul.f32 %v325_v49, %v314_v52 }
  0xab   : > { %v330_v58 = vpop.permute.xlu0 %329 }
  0xac   : > { %v341_v59 = vadd.f32 %v338_v56, %v337_v54  ;;  %v339_v60 = vmul.f32 %v330_v58, %v315_v57 }
  0xad   : > { %v360_v61 = vpop.permute.xlu1 %359 }
  0xae   : > { %v342_v0 = vadd.f32 %v341_v59, %v339_v60  ;;  %v374_v7 = vmul.f32 %v360_v61, %v313_v50 }
  0xaf   : > { %v335_v63 = vpop.permute.xlu0 %334 }
  0xb0   : > { %v340_v1 = vmul.f32 %v335_v63, %v316_v62 }
  0xb1   : > { %v364_v2 = vpop.permute.xlu1 %363 }
  0xb2   : > { %v343_v3 = vadd.f32 %v342_v0, %v340_v1  ;;  %v375_v5 = vmul.f32 %v364_v2, %v314_v52 }
  0xb3   : > { %v354_v20 = vpop.permute.xlu0 %353 }
  0xb4   : > { %v344_v4 = vrot.slane %v343_v3, 4  ;;  %v378_v10 = vadd.f32 %v375_v5, %v374_v7 }
  0xb5   : > { %v368_v6 = vpop.permute.xlu1 %367 }
  0xb6   : > { %v345_v8 = vadd.f32 %v344_v4, %v343_v3  ;;  %v376_v9 = vmul.f32 %v368_v6, %v315_v57 }
  0xb8   : > { %v346_v11 = vrot.slane %v345_v8, 2  ;;  %v379_v14 = vadd.f32 %v378_v10, %v376_v9 }
  0xb9   : > { %v372_v12 = vpop.permute.xlu1 %371 }
  0xba   : > { %v347_v13 = vadd.f32 %v346_v11, %v345_v8  ;;  %v377_v15 = vmul.f32 %v372_v12, %v316_v62 }
  0xbc   : > { %v348_v16 = vrot.slane %v347_v13, 1  ;;  %v380_v17 = vadd.f32 %v379_v14, %v377_v15 }
  0xbe   : > { %v349_v18 = vadd.f32 %v348_v16, %v347_v13  ;;  %v381_v19 = vrot.slane %v380_v17, 4  ;;  %v391_v26 = vpop.permute.xlu1 %390 }
  0xc0   : > { %v356_v21 = vadd.f32 %v354_v20, %v349_v18  ;;  %v382_v22 = vadd.f32 %v381_v19, %v380_v17 }
  0xc2   : > { %357 = vst [vmem:[%s215_s8] sm:$0x1] %v356_v21  ;;  %v383_v23 = vrot.slane %v382_v22, 2 }
  0xc4   : > { %v384_v24 = vadd.f32 %v383_v23, %v382_v22 }
  0xc6   : > { %v385_v25 = vrot.slane %v384_v24, 1 }
  0xc8   : > { %v386_v27 = vadd.f32 %v385_v25, %v384_v24 }
  0xca   : > { %v393_v28 = vadd.f32 %v391_v26, %v386_v27 }
  0xcc   : > { %394 = vst [vmem:[%s215_s8 + $0x1] sm:$0x1] %v393_v28 }
  0xcd   : > { %539 = shalt.err (!%p536_p3)
}
  0xce   : > { %s540_s23 = scalar_lea.hbm %s723_s13, 32  ;;  %s544_s30 = scalar_lea.hbm %s770_s5, 64 }
  0xcf   : > { %p541_p4 = scmp.ne.s32.totalorder %s723_s13, %s540_s23  ;;  %p545_p9 = scmp.lt.u32.totalorder %s723_s13, %s770_s5 }
  0xd0   : > { %p546_p10 = scmp.lt.u32.totalorder %s544_s30, %s540_s23  ;;  %p548_p12 = scmp.lt.u32.totalorder %s540_s23, %s723_s13 }
  0xd1   : > { %p542_p7 = pnand %p541_p4, %p661_p5 }
  0xd2   : > { %p547_p11 = por %p546_p10, %p545_p9 }
  0xd3   : > { %p543_p8 = pneg %p542_p7 }
  0xd4   : > { %p549_p13 = por %p548_p12, %p547_p11 }
  0xd6   : > { %p550_p0 = pnand %p549_p13, %p543_p8 }
  0xd8   : > { %553 = shalt.err (!%p550_p0)
}
  0xd9   : > { %478 = dma.vmem_to_hbm [thread:$0]  (%p661_p5), %s725_s10, 32, %s723_s13, %s396_s14  }
  0xda PF: > { %p484_p1 = scmp.ge.s32.totalorder %s588_s21, 2  ;;  %s421_s8 = sand.u32 1, %s576_s18  }
  0xdb   : > { %s422_s9 = scalar_lea.sflag [#allocation3], %s421_s8 }
  0xdc   : > { %p481_p2 = pnand %p484_p1, %p665_p6 }
  0xde   : > { %571 = dma.done.wait (!%p481_p2), %s422_s9, 32  }
  0xdf   : > { %573 = vsyncadd (!%p481_p2), %s422_s9, 4294967264  ;;  %p15_p3 = scmp.ge.s32.totalorder %s648_s24, 4   ;;  %s773_s18 = smov %s580_s19 }
  0xe0   : > { %s774_s19 = smov %s584_s20  ;;  %s775_s20 = smov %s659_s27 }
  0xe1   : > { %s776_s21 = smov %s648_s24  ;;  %17 = sbr.rel (!%p15_p3) target bundleno = 3 (0x3), region = 75 }
  0xe8   :  { %427 = vsyncpa [#allocation3], 1 }
  0xe9   :  { %429 = vsyncpa [#allocation3 + $0x1], 1 }

</bundles_post_ra>
